<compile_context>
chip_gen: v7x
topology: tpu7x:2x2x1
jax: 0.10.0
libtpu: 0.0.40
codegen_flags: <defaults>
</compile_context>

<pallas_src>
import functools

import jax
import jax.numpy as jnp
from jax import lax
from jax.experimental import pallas as pl
from jax.experimental.pallas import tpu as pltpu


def _classification_kernel(x_ref, w_ref, b_ref, o_ref):
    # (TB, H) contracted with (O, H) over H -> (TB, O); f32 accumulate on MXU.
    logits = lax.dot_general(
        x_ref[...],
        w_ref[...],
        dimension_numbers=(((1,), (1,)), ((), ())),
        preferred_element_type=jnp.float32,
    )
    logits = logits + b_ref[...]  # broadcast (1, O) bias over rows

    # Numerically stable softmax over the last axis (== torch Softmax(dim=1)).
    m = jnp.max(logits, axis=-1, keepdims=True)
    e = jnp.exp(logits - m)
    denom = jnp.sum(e, axis=-1, keepdims=True)
    # Exact division (O is tiny, so this is cheap) -- keeps the probabilities
    # bit-accurate instead of the ~1e-4-level error of the approx reciprocal.
    o_ref[...] = (e / denom).astype(o_ref.dtype)


def _round_up(n, m):
    return ((n + m - 1) // m) * m


@functools.partial(jax.jit, static_argnames=("block_rows",))
def classification_forward(x, weight, bias, *, block_rows=256):
    """x: (B, 1, H) or (B, H); weight: (O, H) torch layout; bias: (O,)."""
    if x.ndim == 3:
        # torch .squeeze(dim=1)
        assert x.shape[1] == 1
        x = x[:, 0, :]
    B, H = x.shape
    O = weight.shape[0]
    b2 = bias.reshape(1, O)  # keep 2-D for TPU layout

    # Batch tile: multiple of 8 sublanes (f32), capped at `block_rows`.
    B_pad8 = _round_up(B, 8)
    TB = min(block_rows, B_pad8)
    B_pad = _round_up(B, TB)
    if B_pad != B:
        x = jnp.pad(x, ((0, B_pad - B), (0, 0)))

    out = pl.pallas_call(
        _classification_kernel,
        out_shape=jax.ShapeDtypeStruct((B_pad, O), jnp.float32),
        grid=(B_pad // TB,),
        in_specs=[
            pl.BlockSpec((TB, H), lambda i: (i, 0)),   # x tile marches over batch
            pl.BlockSpec((O, H), lambda i: (0, 0)),    # weight: VMEM-resident
            pl.BlockSpec((1, O), lambda i: (0, 0)),    # bias:   VMEM-resident
        ],
        out_specs=pl.BlockSpec((TB, O), lambda i: (i, 0)),
        compiler_params=pltpu.CompilerParams(
            dimension_semantics=("parallel",),  # independent batch tiles
        ),
    )(x, weight, b2)
    return out[:B]


if __name__ == "__main__":
    # Small shapes consistent with the module's forward:
    #   x: (batch=2, 1, hidden=32), Linear(32 -> 16), softmax over 16 classes.
    batch, hidden, out_size = 2, 32, 16

    key = jax.random.PRNGKey(0)
    kx, kw, kb = jax.random.split(key, 3)

    x = jax.random.normal(kx, (batch, 1, hidden), dtype=jnp.float32)
    # Deterministic synthetic parameters (PyTorch Linear layout: W (O,H), b (O,)).
    weight = jax.random.normal(kw, (out_size, hidden), dtype=jnp.float32) * 0.1
    bias = jax.random.normal(kb, (out_size,), dtype=jnp.float32) * 0.1

    y = classification_forward(x, weight, bias)
    y = jax.block_until_ready(y)

    # Pure-JAX reference (matmul + bias + softmax over dim=1) at highest
    # precision so the comparison is against real f32 math.
    x2 = x[:, 0, :]
    logits_ref = jnp.dot(x2, weight.T, precision=lax.Precision.HIGHEST) + bias
    ref = jax.nn.softmax(logits_ref, axis=1)

    assert y.shape == (batch, out_size)
    # Tolerance sized for MXU multi-pass f32 rounding on probabilities in [0,1].
    assert jnp.allclose(y, ref, atol=2e-3, rtol=2e-3), (
        f"max abs err {jnp.max(jnp.abs(y - ref))}"
    )
    assert jnp.allclose(jnp.sum(y, axis=1), jnp.ones((batch,)), atol=1e-3)

    print("KERNEL_OK")
</pallas_src>

<mosaic_0001>
module attributes {stable_mosaic.version = 11 : i64} {
  func.func @_classification_kernel(%arg0: i32, %arg1: memref<8x32xf32, #tpu.memory_space<vmem>>, %arg2: memref<16x32xf32, #tpu.memory_space<vmem>>, %arg3: memref<1x16xf32, #tpu.memory_space<vmem>>, %arg4: memref<8x16xf32, #tpu.memory_space<vmem>>) attributes {dimension_semantics = [#tpu.dimension_semantics<parallel>], iteration_bounds = array<i64: 1>, scalar_prefetch = 0 : i64, scratch_operands = 0 : i64, tpu.core_type = #tpu.core_type<tc>, window_params = [{transform_indices = @transform_0, window_bounds = array<i64: 8, 32>}, {pipeline_mode = #tpu.pipeline_mode<synchronous>, transform_indices = @transform_1, window_bounds = array<i64: 16, 32>}, {pipeline_mode = #tpu.pipeline_mode<synchronous>, transform_indices = @transform_2, window_bounds = array<i64: 1, 16>}, {transform_indices = @transform_3, window_bounds = array<i64: 8, 16>}]} {
    %c0 = arith.constant 0 : index
    %c0_0 = arith.constant 0 : index
    %0 = vector.load %arg1[%c0, %c0_0] : memref<8x32xf32, #tpu.memory_space<vmem>>, vector<8x32xf32>
    %c0_1 = arith.constant 0 : index
    %c0_2 = arith.constant 0 : index
    %1 = vector.load %arg2[%c0_1, %c0_2] : memref<16x32xf32, #tpu.memory_space<vmem>>, vector<16x32xf32>
    %cst = arith.constant dense<0.000000e+00> : vector<8x16xf32>
    %2 = tpu.matmul %0, %1, %cst {dimension_numbers = #tpu.dot_dimension_numbers<[1], [1], [0], [0], [0, 0, 1, 0], [], []>} : vector<8x32xf32>, vector<16x32xf32>, vector<8x16xf32> -> vector<8x16xf32>
    %c0_3 = arith.constant 0 : index
    %c0_4 = arith.constant 0 : index
    %3 = vector.load %arg3[%c0_3, %c0_4] : memref<1x16xf32, #tpu.memory_space<vmem>>, vector<1x16xf32>
    %4 = vector.broadcast %3 : vector<1x16xf32> to vector<8x16xf32>
    %5 = arith.addf %2, %4 : vector<8x16xf32>
    %cst_5 = arith.constant dense<0xFF800000> : vector<8xf32>
    %6 = vector.multi_reduction <maximumf>, %5, %cst_5 [1] : vector<8x16xf32> to vector<8xf32>
    %7 = vector.shape_cast %6 : vector<8xf32> to vector<8x1xf32>
    %8 = vector.broadcast %7 : vector<8x1xf32> to vector<8x16xf32>
    %9 = arith.subf %5, %8 : vector<8x16xf32>
    %10 = math.exp %9 : vector<8x16xf32>
    %cst_6 = arith.constant dense<0.000000e+00> : vector<8xf32>
    %11 = vector.multi_reduction <add>, %10, %cst_6 [1] : vector<8x16xf32> to vector<8xf32>
    %12 = vector.shape_cast %11 : vector<8xf32> to vector<8x1xf32>
    %13 = vector.broadcast %12 : vector<8x1xf32> to vector<8x16xf32>
    %14 = arith.divf %10, %13 : vector<8x16xf32>
    %c0_7 = arith.constant 0 : index
    %c0_8 = arith.constant 0 : index
    %15 = vector.load %arg4[%c0_7, %c0_8] : memref<8x16xf32, #tpu.memory_space<vmem>>, vector<8x16xf32>
    tpu.vector_store %arg4[%c0_7, %c0_8], %14 {strides = array<i32>} : memref<8x16xf32, #tpu.memory_space<vmem>>, vector<8x16xf32>,
    return
  }
  func.func @transform_0(%arg0: i32) -> (i32, i32) {
    %c0_i32 = arith.constant 0 : i32
    %c0_i32_0 = arith.constant 0 : i32
    return %arg0, %c0_i32 : i32, i32
  }
  func.func @transform_1(%arg0: i32) -> (i32, i32) {
    %c0_i32 = arith.constant 0 : i32
    %c0_i32_0 = arith.constant 0 : i32
    %c0_i32_1 = arith.constant 0 : i32
    return %c0_i32, %c0_i32_0 : i32, i32
  }
  func.func @transform_2(%arg0: i32) -> (i32, i32) {
    %c0_i32 = arith.constant 0 : i32
    %c0_i32_0 = arith.constant 0 : i32
    %c0_i32_1 = arith.constant 0 : i32
    return %c0_i32, %c0_i32_0 : i32, i32
  }
  func.func @transform_3(%arg0: i32) -> (i32, i32) {
    %c0_i32 = arith.constant 0 : i32
    %c0_i32_0 = arith.constant 0 : i32
    return %arg0, %c0_i32 : i32, i32
  }
}

</mosaic_0001>

<bundles_post_ra>
// kernel: classification_forward.1
= control target key start
LH: loop header
LB: loop body
LE: loop exit
PB: predicated region body
PF: predicated region fallthrough
CT: control target
= control target key end

     0   :  { %vm24_vm0 = vcmask 261120   ;;  %v146_v0 = vmov 0.0|0.0   ;;  %vm147_vm2 = vmmov 0   ;;  %v148_v3 = vmov 0.0   ;;  %s187_s1 = inlined_call_operand.vmem [shape: f32[16,32], index: 1, kind: input, shape index: {}]   ;;  %s188_s0 = inlined_call_operand.vmem [shape: f32[8,32], index: 0, kind: input, shape index: {}]   ;;  %s189_s2 = inlined_call_operand.vmem [shape: f32[1,16], index: 2, kind: input, shape index: {}]   ;;  %s190_s3 = inlined_call_operand.vmem [shape: f32[8,16], index: 3, kind: output, shape index: {}]  }
   0x1   :  { %135 = vmatprep.subr.bf16.mxu0 %v146_v0  ;;  %v15_v1 = vld [vmem:[%s187_s1] sm:$0xff]  ;;  %v16_v2 = vld [vmem:[%s187_s1 + $0x8] sm:$0xff]  ;;  %vm137_vm1 = vmpackc.low %vm24_vm0, %vm24_vm0  ;;  %132 = vmatprep.mubr.msk.f32.mxu0 %vm147_vm2, %v148_v3  ;;  %vm104_vm3 = vcmask 130048  }
   0x2   :  { %v136_v4 = vpack.c.bf16 %v16_v2, %v15_v1  ;;  %v14_v5 = vld [vmem:[%s188_s0] sm:$0xff] }
   0x3   :  { %v121_v6 = vld [vmem:[%s189_s2] ss:$0 sm:$0xff] }
   0x4   :  { %138 = vmatpush3.bf16.xpose.msk.msra.mxu0 %vm137_vm1, %v136_v4 }
   0xb   :  { %133 = vmatmul.mubr.msk.f32.vlgmr.msra.gmra.mrb[0].mxu0 %vm24_vm0, %v14_v5 }
  0xde   :  { %v100_v7 = vpop.f32.mrb[0].mxu0 }
  0xdf   :  { %v101_v8 = vadd.f32 %v121_v6, %v100_v7  ;;  %v134_v9 = vpop.f32.mrb[1].mxu0 }
  0xe1   :  { %v105_v10 = vsel %vm104_vm3, %v101_v8, -inf }
  0xe2   :  { %106 = vmax.xlane.f32.xlu0 %v105_v10 }
 0x16f   :  { %v107_v11 = vpop.xlane.xlu0 %106 }
 0x170   :  { %v108_v12 = vsub.f32 %v101_v8, %v107_v11 }
 0x172   :  { %v109_v13 = vmul.f32 1.442695, %v108_v12 }
 0x174   :  { %142 = vpow2.f32 %v109_v13 }
 0x17e   :  { %v143_v14 = vpop.eup %142 }
 0x17f   :  { %v111_v15 = vsel %vm104_vm3, %v143_v14, 0.0 }
 0x180   :  { %112 = vadd.xlane.f32.xlu0 %v111_v15 }
 0x20d   :  { %v113_v16 = vpop.xlane.xlu0 %112 }
 0x20e   :  { %144 = vrcp.f32 %v113_v16 }
 0x218   :  { %v145_v17 = vpop.eup %144 }
 0x219   :  { %v115_v18 = vmul.f32 %v145_v17, %v143_v14 }
 0x21b   :  { %116 = vst.msk [vmem:[%s190_s3] sm:$0xff] %vm104_vm3, %v115_v18 }

</bundles_post_ra>
